<compile_context>
chip_gen: v5e
topology: v5e:2x2
jax: 0.10.0
libtpu: 0.0.40
codegen_flags: <defaults>
</compile_context>

<pallas_src>
import functools

import jax
import jax.numpy as jnp
from jax.experimental import pallas as pl
from jax.experimental.pallas import tpu as pltpu


def _round_up(x, m):
    return ((x + m - 1) // m) * m


def _ssd_multibox_loss_kernel(loc_p_ref, loc_g_ref, logit_ref, label_ref,
                              out_ref, xpad_ref, acc_ref, *,
                              num_classes, tile_n, tiles_per_split,
                              num_anchors, d_off):
    p = pl.program_id(0)
    j = pl.program_id(2)

    @pl.when(j == 0)
    def _init():
        acc_ref[...] = jnp.zeros_like(acc_ref)

    # ---- stage native-layout tiles into the 128-lane relayout scratch ----
    x_nat = logit_ref[0].astype(jnp.float32)                       # [TN, C]
    d_nat = (loc_p_ref[0].astype(jnp.float32)
             - loc_g_ref[0].astype(jnp.float32))                   # [TN, 4]
    xpad_ref[:, :num_classes] = x_nat
    xpad_ref[:, d_off:d_off + 4] = d_nat

    # one aligned (TN, W) -> (W, TN) XLU transpose relays logits AND loc diff
    xt = jnp.transpose(xpad_ref[...], (1, 0))                      # [W, TN]
    x = xt[:num_classes, :]                                        # [C, TN]
    d = xt[d_off:d_off + 4, :]                                     # [4, TN]

    # ---- per-anchor masks (anchors on the 128-lane axis) ----
    tile_idx = p * tiles_per_split + j
    base = tile_idx * tile_n
    lane = jax.lax.broadcasted_iota(jnp.int32, (1, tile_n), 1)
    valid = (base + lane) < num_anchors                            # [1, TN]
    gt_label = label_ref[0]                                        # [1, TN] i32
    pos = jnp.logical_and(valid, gt_label > 0)

    # ---- localization: SmoothL1 (beta = 1) on positive anchors ----
    dm = jnp.where(pos, d, 0.0)          # also kills garbage lanes of ragged tiles
    a = jnp.abs(dm)
    m = jnp.minimum(a, 1.0)
    sl1 = m * (a - 0.5 * m)              # == 0.5*a^2 if a < 1 else a - 0.5
    loss_loc = jnp.sum(sl1)

    # ---- classification: sigmoid focal loss (gamma = 2, alpha = 0.75) ----
    x = jnp.where(valid, x, 0.0)
    cls_iota = jax.lax.broadcasted_iota(jnp.int32, (num_classes, 1), 0)
    is_gt = cls_iota == gt_label                                   # [C, TN]

    e = jnp.exp(-jnp.abs(x))                 # single exp per element (EUP)
    log1pe = jnp.log(1.0 + e)                # stable BCE-with-logits term
    t = pl.reciprocal(1.0 + e, approx=True)  # sigmoid(|x|)

    sce = jnp.maximum(x, 0.0) + jnp.where(is_gt, -x, 0.0) + log1pe
    one_minus_pt = jnp.where(jnp.logical_xor(is_gt, x < 0.0), e * t, t)
    weight = jnp.where(is_gt, 0.75, 0.25) * valid.astype(jnp.float32)
    focal = (one_minus_pt * one_minus_pt) * (weight * sce)
    loss_cls = jnp.sum(focal)

    acc_ref[...] = acc_ref[...] + (loss_loc + loss_cls)

    @pl.when(j == pl.num_programs(2) - 1)
    def _finalize():
        out_ref[0, 0] = acc_ref[...]


def ssd_multibox_loss(pred_loc, pred_label, gt_loc, gt_label,
                      num_matched_boxes, *, tile_n=None, num_splits=None):
    """Matches loss_SSDmultibox_torch.forward (SmoothL1 + sigmoid focal loss)."""
    B, N, C = pred_label.shape
    N_i, C_i = int(N), int(C)

    # relayout scratch lane width: logits in [0, C), loc diff in the last 4 lanes
    lane_w = max(128, _round_up(C_i + 4, 128))
    d_off = lane_w - 4

    # per-anchor VMEM footprint: double-buffered input blocks (minor dims pad
    # to 128 lanes) + relayout scratch + transposed temp + ~6 live [C,tn] temps
    c_pad = _round_up(C_i, 128)
    per_anchor = (2 * (4 * c_pad + 2 * 4 * 128 + 32)
                  + 2 * 4 * lane_w
                  + 24 * C_i)

    # ---- anchor tile size (generation-aware VMEM cap, v7x = 64 MiB) ----
    if tile_n is None:
        try:
            cap = pltpu.get_tpu_info().vmem_capacity_bytes
        except Exception:  # be conservative if the query is unavailable
            cap = 64 * 1024 * 1024
        budget = min(int(cap * 0.4), 48 * 1024 * 1024)
        tn = (budget // per_anchor) // 512 * 512
        tn = max(512, min(8192, tn))
    else:
        tn = max(128, _round_up(int(tile_n), 128))
    if N_i >= 128:
        tn = min(tn, (N_i // 128) * 128)
    else:
        tn = 128

    n_tiles = -(-N_i // tn)                      # ragged tail handled in-kernel

    # ---- leading split axis: guarantees 2 parallel streams on v7x if B == 1
    if num_splits is None:
        splits = 2 if B == 1 else 1
    else:
        splits = max(1, int(num_splits))
    splits = min(splits, n_tiles)
    tps = -(-n_tiles // splits)

    labels_row = gt_label.astype(jnp.int32).reshape(B, 1, N)   # free reshape

    vmem_limit = int(min(max(per_anchor * tn + (2 << 20), 32 * 1024 * 1024),
                         100 * 1024 * 1024))

    kernel = functools.partial(
        _ssd_multibox_loss_kernel,
        num_classes=C_i, tile_n=tn, tiles_per_split=tps,
        num_anchors=N_i, d_off=d_off)

    def nmap(pp, bb, jj):   # native [B, N, *] tensors
        return (bb, jnp.minimum(pp * tps + jj, n_tiles - 1), 0)

    def lmap(pp, bb, jj):   # label row [B, 1, N]
        return (bb, 0, jnp.minimum(pp * tps + jj, n_tiles - 1))

    per_stream = pl.pallas_call(
        kernel,
        out_shape=jax.ShapeDtypeStruct((splits, B, 1, 1), jnp.float32),
        grid_spec=pltpu.PrefetchScalarGridSpec(
            num_scalar_prefetch=0,
            grid=(splits, B, tps),
            in_specs=[
                pl.BlockSpec((1, tn, 4), nmap),      # pred_loc  [B,N,4]
                pl.BlockSpec((1, tn, 4), nmap),      # gt_loc    [B,N,4]
                pl.BlockSpec((1, tn, C_i), nmap),    # pred_label[B,N,C]
                pl.BlockSpec((1, 1, tn), lmap),      # gt_label  [B,1,N]
            ],
            out_specs=pl.BlockSpec((1, 1, 1, 1),
                                   lambda pp, bb, jj: (pp, bb, 0, 0)),
            scratch_shapes=[
                pltpu.VMEM((tn, lane_w), jnp.float32),   # relayout scratch
                pltpu.VMEM((1, 1), jnp.float32),         # running loss
            ],
        ),
        compiler_params=pltpu.CompilerParams(
            dimension_semantics=("parallel", "parallel", "arbitrary"),
            vmem_limit_bytes=vmem_limit,
        ),
    )(pred_loc, gt_loc, pred_label, labels_row)

    num_matched = jnp.sum(num_matched_boxes.astype(jnp.float32))
    return jnp.sum(per_stream) / num_matched


def _reference_loss(pred_loc, pred_label, gt_loc, gt_label, num_matched_boxes):
    """Pure-JAX reference mirroring the PyTorch module."""
    mask = (gt_label > 0).astype(jnp.float32)
    num_matched = jnp.sum(num_matched_boxes.astype(jnp.float32))
    diff = pred_loc.astype(jnp.float32) - gt_loc.astype(jnp.float32)
    absd = jnp.abs(diff)
    sl1 = jnp.where(absd < 1.0, 0.5 * diff * diff, absd - 0.5)
    loss_loc = jnp.sum(sl1 * mask[..., None], axis=(1, 2))
    x = pred_label.astype(jnp.float32)
    label_oh = jax.nn.one_hot(gt_label, x.shape[-1], dtype=jnp.float32)
    sce = jnp.maximum(x, 0.0) - x * label_oh + jnp.log1p(jnp.exp(-jnp.abs(x)))
    sig = jax.nn.sigmoid(x)
    p_t = label_oh * sig + (1.0 - label_oh) * (1.0 - sig)
    focal = (1.0 - p_t) ** 2 * (label_oh * 0.75 + (1.0 - label_oh) * 0.25) * sce
    loss_cls = jnp.sum(focal, axis=(1, 2))
    return jnp.sum((loss_cls + loss_loc) / num_matched)


if __name__ == "__main__":
    # small shapes; N=300 is deliberately not a multiple of the tile so the
    # ragged-tail masking (no wrapper pad) is exercised.
    B, N, C = 2, 300, 21

    key = jax.random.PRNGKey(0)
    k1, k2, k3, k4 = jax.random.split(key, 4)
    pred_loc = jax.random.normal(k1, (B, N, 4), dtype=jnp.float32)
    pred_label = jax.random.normal(k2, (B, N, C), dtype=jnp.float32)
    gt_loc = jax.random.normal(k3, (B, N, 4), dtype=jnp.float32)
    gt_label = jax.random.randint(k4, (B, N), 0, C, dtype=jnp.int32)
    num_matched_boxes = jnp.maximum(
        jnp.sum((gt_label > 0).astype(jnp.int32), axis=1), 1)  # [B]

    ref = _reference_loss(pred_loc, pred_label, gt_loc, gt_label,
                          num_matched_boxes)

    # default config (auto tile, single split): 2 tiles of 256, ragged tail
    loss_fn = jax.jit(ssd_multibox_loss)
    loss = jax.block_until_ready(
        loss_fn(pred_loc, pred_label, gt_loc, gt_label, num_matched_boxes))
    assert jnp.allclose(loss, ref, rtol=5e-3, atol=5e-3), (loss, ref)

    # forced 2-way split (v7x two-TensorCore path) with a dead tail tile
    loss_fn2 = jax.jit(functools.partial(ssd_multibox_loss,
                                         tile_n=128, num_splits=2))
    loss2 = jax.block_until_ready(
        loss_fn2(pred_loc, pred_label, gt_loc, gt_label, num_matched_boxes))
    assert jnp.allclose(loss2, ref, rtol=5e-3, atol=5e-3), (loss2, ref)

    print("KERNEL_OK")
</pallas_src>

<mosaic_0001>
module attributes {stable_mosaic.version = 11 : i64} {
  func.func @_ssd_multibox_loss_kernel(%arg0: i32, %arg1: i32, %arg2: i32, %arg3: memref<1x256x4xf32, #tpu.memory_space<vmem>>, %arg4: memref<1x256x4xf32, #tpu.memory_space<vmem>>, %arg5: memref<1x256x21xf32, #tpu.memory_space<vmem>>, %arg6: memref<1x1x256xi32, #tpu.memory_space<vmem>>, %arg7: memref<1x1x1x1xf32, #tpu.memory_space<vmem>>, %arg8: memref<256x128xf32, #tpu.memory_space<vmem>>, %arg9: memref<1x1xf32, #tpu.memory_space<vmem>>) attributes {dimension_semantics = [#tpu.dimension_semantics<parallel>, #tpu.dimension_semantics<parallel>, #tpu.dimension_semantics<arbitrary>], iteration_bounds = array<i64: 1, 2, 2>, scalar_prefetch = 0 : i64, scratch_operands = 2 : i64, tpu.core_type = #tpu.core_type<tc>, window_params = [{transform_indices = @transform_0, window_bounds = array<i64: 1, 256, 4>}, {transform_indices = @transform_1, window_bounds = array<i64: 1, 256, 4>}, {transform_indices = @transform_2, window_bounds = array<i64: 1, 256, 21>}, {transform_indices = @transform_3, window_bounds = array<i64: 1, 1, 256>}, {transform_indices = @transform_4, window_bounds = array<i64: 1, 1, 1, 1>}]} {
    %c0_i32 = arith.constant 0 : i32
    %0 = arith.cmpi eq, %arg2, %c0_i32 : i32
    %1 = arith.extui %0 : i1 to i32
    %c0_i32_0 = arith.constant 0 : i32
    %2 = arith.cmpi ne, %1, %c0_i32_0 : i32
    scf.if %2 {
      %cst_37 = arith.constant 0.000000e+00 : f32
      %97 = vector.broadcast %cst_37 : f32 to vector<1x1xf32>
      %c0_38 = arith.constant 0 : index
      %c0_39 = arith.constant 0 : index
      %98 = vector.load %arg9[%c0_38, %c0_39] : memref<1x1xf32, #tpu.memory_space<vmem>>, vector<1x1xf32>
      tpu.vector_store %arg9[%c0_38, %c0_39], %97 {strides = array<i32>} : memref<1x1xf32, #tpu.memory_space<vmem>>, vector<1x1xf32>,
    } else {
    }
    %c0 = arith.constant 0 : index
    %c0_1 = arith.constant 0 : index
    %c0_2 = arith.constant 0 : index
    %3 = vector.load %arg5[%c0, %c0_1, %c0_2] : memref<1x256x21xf32, #tpu.memory_space<vmem>>, vector<1x256x21xf32>
    %4 = vector.shape_cast %3 : vector<1x256x21xf32> to vector<256x21xf32>
    %c0_3 = arith.constant 0 : index
    %c0_4 = arith.constant 0 : index
    %c0_5 = arith.constant 0 : index
    %5 = vector.load %arg3[%c0_3, %c0_4, %c0_5] : memref<1x256x4xf32, #tpu.memory_space<vmem>>, vector<1x256x4xf32>
    %6 = vector.shape_cast %5 : vector<1x256x4xf32> to vector<256x4xf32>
    %c0_6 = arith.constant 0 : index
    %c0_7 = arith.constant 0 : index
    %c0_8 = arith.constant 0 : index
    %7 = vector.load %arg4[%c0_6, %c0_7, %c0_8] : memref<1x256x4xf32, #tpu.memory_space<vmem>>, vector<1x256x4xf32>
    %8 = vector.shape_cast %7 : vector<1x256x4xf32> to vector<256x4xf32>
    %9 = arith.subf %6, %8 : vector<256x4xf32>
    %c0_9 = arith.constant 0 : index
    %c0_10 = arith.constant 0 : index
    %10 = vector.load %arg8[%c0_9, %c0_10] : memref<256x128xf32, #tpu.memory_space<vmem>>, vector<256x21xf32>
    tpu.vector_store %arg8[%c0_9, %c0_10], %4 {strides = array<i32>} : memref<256x128xf32, #tpu.memory_space<vmem>>, vector<256x21xf32>,
    %c0_11 = arith.constant 0 : index
    %c124 = arith.constant 124 : index
    %11 = vector.load %arg8[%c0_11, %c124] : memref<256x128xf32, #tpu.memory_space<vmem>>, vector<256x4xf32>
    tpu.vector_store %arg8[%c0_11, %c124], %9 {strides = array<i32>} : memref<256x128xf32, #tpu.memory_space<vmem>>, vector<256x4xf32>,
    %c0_12 = arith.constant 0 : index
    %c0_13 = arith.constant 0 : index
    %12 = vector.load %arg8[%c0_12, %c0_13] : memref<256x128xf32, #tpu.memory_space<vmem>>, vector<256x128xf32>
    %13 = tpu.transpose %12, [1, 0] : vector<256x128xf32> -> vector<128x256xf32>
    %14 = vector.extract_strided_slice %13 {offsets = [0, 0], sizes = [21, 256], strides = [1, 1]} : vector<128x256xf32> to vector<21x256xf32>
    %15 = vector.extract_strided_slice %13 {offsets = [124, 0], sizes = [4, 256], strides = [1, 1]} : vector<128x256xf32> to vector<4x256xf32>
    %c2_i32 = arith.constant 2 : i32
    %16 = arith.muli %arg0, %c2_i32 : i32
    %17 = arith.addi %16, %arg2 : i32
    %c256_i32 = arith.constant 256 : i32
    %18 = arith.muli %17, %c256_i32 : i32
    %19 = tpu.iota {dimensions = array<i32: 1>} : vector<1x256xi32>
    %20 = vector.broadcast %18 : i32 to vector<1x256xi32>
    %21 = arith.addi %20, %19 : vector<1x256xi32>
    %c300_i32 = arith.constant 300 : i32
    %22 = vector.broadcast %c300_i32 : i32 to vector<1x256xi32>
    %23 = arith.cmpi slt, %21, %22 : vector<1x256xi32>
    %c0_14 = arith.constant 0 : index
    %c0_15 = arith.constant 0 : index
    %c0_16 = arith.constant 0 : index
    %24 = vector.load %arg6[%c0_14, %c0_15, %c0_16] : memref<1x1x256xi32, #tpu.memory_space<vmem>>, vector<1x1x256xi32>
    %25 = vector.shape_cast %24 : vector<1x1x256xi32> to vector<1x256xi32>
    %c0_i32_17 = arith.constant 0 : i32
    %26 = vector.broadcast %c0_i32_17 : i32 to vector<1x256xi32>
    %27 = arith.cmpi sgt, %25, %26 : vector<1x256xi32>
    %28 = arith.andi %23, %27 : vector<1x256xi1>
    %cst = arith.constant 0.000000e+00 : f32
    %29 = vector.shape_cast %28 : vector<1x256xi1> to vector<1x256xi1>
    %30 = vector.broadcast %29 : vector<1x256xi1> to vector<4x256xi1>
    %31 = vector.broadcast %cst : f32 to vector<4x256xf32>
    %32 = arith.select %30, %15, %31 : vector<4x256xi1>, vector<4x256xf32>
    %33 = math.absf %32 : vector<4x256xf32>
    %cst_18 = arith.constant 1.000000e+00 : f32
    %34 = vector.broadcast %cst_18 : f32 to vector<4x256xf32>
    %35 = arith.minimumf %33, %34 : vector<4x256xf32>
    %cst_19 = arith.constant 5.000000e-01 : f32
    %36 = vector.broadcast %cst_19 : f32 to vector<4x256xf32>
    %37 = arith.mulf %36, %35 : vector<4x256xf32>
    %38 = arith.subf %33, %37 : vector<4x256xf32>
    %39 = arith.mulf %35, %38 : vector<4x256xf32>
    %40 = vector.shape_cast %39 : vector<4x256xf32> to vector<1x4x256xf32>
    %cst_20 = arith.constant dense<0.000000e+00> : vector<1xf32>
    %41 = vector.multi_reduction <add>, %40, %cst_20 [1, 2] : vector<1x4x256xf32> to vector<1xf32>
    %42 = vector.shape_cast %41 : vector<1xf32> to vector<1x1x1xf32>
    %43 = vector.extract %42[0, 0, 0] : f32 from vector<1x1x1xf32>
    %cst_21 = arith.constant 0.000000e+00 : f32
    %44 = vector.shape_cast %23 : vector<1x256xi1> to vector<1x256xi1>
    %45 = vector.broadcast %44 : vector<1x256xi1> to vector<21x256xi1>
    %46 = vector.broadcast %cst_21 : f32 to vector<21x256xf32>
    %47 = arith.select %45, %14, %46 : vector<21x256xi1>, vector<21x256xf32>
    %48 = tpu.iota {dimensions = array<i32: 0>} : vector<21x1xi32>
    %49 = vector.broadcast %48 : vector<21x1xi32> to vector<21x256xi32>
    %50 = vector.broadcast %25 : vector<1x256xi32> to vector<21x256xi32>
    %51 = arith.cmpi eq, %49, %50 : vector<21x256xi32>
    %52 = math.absf %47 : vector<21x256xf32>
    %cst_22 = arith.constant 0.000000e+00 : f32
    %53 = vector.broadcast %cst_22 : f32 to vector<21x256xf32>
    %54 = arith.subf %53, %52 : vector<21x256xf32>
    %55 = math.exp %54 : vector<21x256xf32>
    %cst_23 = arith.constant 1.000000e+00 : f32
    %56 = vector.broadcast %cst_23 : f32 to vector<21x256xf32>
    %57 = arith.addf %56, %55 : vector<21x256xf32>
    %58 = math.log %57 : vector<21x256xf32>
    %cst_24 = arith.constant 1.000000e+00 : f32
    %59 = vector.broadcast %cst_24 : f32 to vector<21x256xf32>
    %60 = arith.addf %59, %55 : vector<21x256xf32>
    %61 = tpu.reciprocal %60 {approx = true} : vector<21x256xf32> -> vector<21x256xf32>
    %cst_25 = arith.constant 0.000000e+00 : f32
    %62 = vector.broadcast %cst_25 : f32 to vector<21x256xf32>
    %63 = arith.maximumf %47, %62 : vector<21x256xf32>
    %cst_26 = arith.constant 0.000000e+00 : f32
    %64 = vector.broadcast %cst_26 : f32 to vector<21x256xf32>
    %65 = arith.subf %64, %47 : vector<21x256xf32>
    %cst_27 = arith.constant 0.000000e+00 : f32
    %66 = vector.broadcast %cst_27 : f32 to vector<21x256xf32>
    %67 = arith.select %51, %65, %66 : vector<21x256xi1>, vector<21x256xf32>
    %68 = arith.addf %63, %67 : vector<21x256xf32>
    %69 = arith.addf %68, %58 : vector<21x256xf32>
    %cst_28 = arith.constant 0.000000e+00 : f32
    %70 = vector.broadcast %cst_28 : f32 to vector<21x256xf32>
    %71 = arith.cmpf olt, %47, %70 : vector<21x256xf32>
    %72 = arith.xori %51, %71 : vector<21x256xi1>
    %73 = arith.mulf %55, %61 : vector<21x256xf32>
    %74 = arith.select %72, %73, %61 : vector<21x256xi1>, vector<21x256xf32>
    %cst_29 = arith.constant 7.500000e-01 : f32
    %cst_30 = arith.constant 2.500000e-01 : f32
    %75 = vector.broadcast %cst_29 : f32 to vector<21x256xf32>
    %76 = vector.broadcast %cst_30 : f32 to vector<21x256xf32>
    %77 = arith.select %51, %75, %76 : vector<21x256xi1>, vector<21x256xf32>
    %78 = arith.extui %23 : vector<1x256xi1> to vector<1x256xi32>
    %79 = arith.sitofp %78 : vector<1x256xi32> to vector<1x256xf32>
    %80 = vector.broadcast %79 : vector<1x256xf32> to vector<21x256xf32>
    %81 = arith.mulf %77, %80 : vector<21x256xf32>
    %82 = arith.mulf %74, %74 : vector<21x256xf32>
    %83 = arith.mulf %81, %69 : vector<21x256xf32>
    %84 = arith.mulf %82, %83 : vector<21x256xf32>
    %85 = vector.shape_cast %84 : vector<21x256xf32> to vector<1x21x256xf32>
    %cst_31 = arith.constant dense<0.000000e+00> : vector<1xf32>
    %86 = vector.multi_reduction <add>, %85, %cst_31 [1, 2] : vector<1x21x256xf32> to vector<1xf32>
    %87 = vector.shape_cast %86 : vector<1xf32> to vector<1x1x1xf32>
    %88 = vector.extract %87[0, 0, 0] : f32 from vector<1x1x1xf32>
    %c0_32 = arith.constant 0 : index
    %c0_33 = arith.constant 0 : index
    %89 = vector.load %arg9[%c0_32, %c0_33] : memref<1x1xf32, #tpu.memory_space<vmem>>, vector<1x1xf32>
    %90 = arith.addf %43, %88 : f32
    %91 = vector.broadcast %90 : f32 to vector<1x1xf32>
    %92 = arith.addf %89, %91 : vector<1x1xf32>
    %c0_34 = arith.constant 0 : index
    %c0_35 = arith.constant 0 : index
    %93 = vector.load %arg9[%c0_34, %c0_35] : memref<1x1xf32, #tpu.memory_space<vmem>>, vector<1x1xf32>
    tpu.vector_store %arg9[%c0_34, %c0_35], %92 {strides = array<i32>} : memref<1x1xf32, #tpu.memory_space<vmem>>, vector<1x1xf32>,
    %c1_i32 = arith.constant 1 : i32
    %94 = arith.cmpi eq, %arg2, %c1_i32 : i32
    %95 = arith.extui %94 : i1 to i32
    %c0_i32_36 = arith.constant 0 : i32
    %96 = arith.cmpi ne, %95, %c0_i32_36 : i32
    scf.if %96 {
      %c0_37 = arith.constant 0 : index
      %c0_38 = arith.constant 0 : index
      %97 = vector.load %arg9[%c0_37, %c0_38] : memref<1x1xf32, #tpu.memory_space<vmem>>, vector<1x1xf32>
      %c0_39 = arith.constant 0 : index
      %c0_40 = arith.constant 0 : index
      %c0_41 = arith.constant 0 : index
      %c0_42 = arith.constant 0 : index
      %98 = vector.load %arg7[%c0_39, %c0_40, %c0_41, %c0_42] : memref<1x1x1x1xf32, #tpu.memory_space<vmem>>, vector<1x1x1x1xf32>
      %99 = vector.shape_cast %98 : vector<1x1x1x1xf32> to vector<1x1xf32>
      %100 = vector.shape_cast %97 : vector<1x1xf32> to vector<1x1x1x1xf32>
      tpu.vector_store %arg7[%c0_39, %c0_40, %c0_41, %c0_42], %100 {strides = array<i32>} : memref<1x1x1x1xf32, #tpu.memory_space<vmem>>, vector<1x1x1x1xf32>,
    } else {
    }
    return
  }
  func.func @transform_0(%arg0: i32, %arg1: i32, %arg2: i32) -> (i32, i32, i32) {
    %c2_i32 = arith.constant 2 : i32
    %0 = arith.muli %arg0, %c2_i32 : i32
    %1 = arith.addi %0, %arg2 : i32
    %c1_i32 = arith.constant 1 : i32
    %2 = arith.minsi %1, %c1_i32 : i32
    %c0_i32 = arith.constant 0 : i32
    %c0_i32_0 = arith.constant 0 : i32
    return %arg1, %2, %c0_i32 : i32, i32, i32
  }
  func.func @transform_1(%arg0: i32, %arg1: i32, %arg2: i32) -> (i32, i32, i32) {
    %c2_i32 = arith.constant 2 : i32
    %0 = arith.muli %arg0, %c2_i32 : i32
    %1 = arith.addi %0, %arg2 : i32
    %c1_i32 = arith.constant 1 : i32
    %2 = arith.minsi %1, %c1_i32 : i32
    %c0_i32 = arith.constant 0 : i32
    %c0_i32_0 = arith.constant 0 : i32
    return %arg1, %2, %c0_i32 : i32, i32, i32
  }
  func.func @transform_2(%arg0: i32, %arg1: i32, %arg2: i32) -> (i32, i32, i32) {
    %c2_i32 = arith.constant 2 : i32
    %0 = arith.muli %arg0, %c2_i32 : i32
    %1 = arith.addi %0, %arg2 : i32
    %c1_i32 = arith.constant 1 : i32
    %2 = arith.minsi %1, %c1_i32 : i32
    %c0_i32 = arith.constant 0 : i32
    %c0_i32_0 = arith.constant 0 : i32
    return %arg1, %2, %c0_i32 : i32, i32, i32
  }
  func.func @transform_3(%arg0: i32, %arg1: i32, %arg2: i32) -> (i32, i32, i32) {
    %c2_i32 = arith.constant 2 : i32
    %0 = arith.muli %arg0, %c2_i32 : i32
    %1 = arith.addi %0, %arg2 : i32
    %c1_i32 = arith.constant 1 : i32
    %2 = arith.minsi %1, %c1_i32 : i32
    %c0_i32 = arith.constant 0 : i32
    %c0_i32_0 = arith.constant 0 : i32
    return %arg1, %c0_i32, %2 : i32, i32, i32
  }
  func.func @transform_4(%arg0: i32, %arg1: i32, %arg2: i32) -> (i32, i32, i32, i32) {
    %c0_i32 = arith.constant 0 : i32
    %c0_i32_0 = arith.constant 0 : i32
    %c0_i32_1 = arith.constant 0 : i32
    return %arg0, %arg1, %c0_i32, %c0_i32_0 : i32, i32, i32, i32
  }
}

</mosaic_0001>

<bundles_post_ra>
// kernel: ssd_multibox_loss.1
= control target key start
LH: loop header
LB: loop body
LE: loop exit
PB: predicated region body
PF: predicated region fallthrough
CT: control target
= control target key end

     0   :  { %s1507_s15 = smov 0   ;;  %s1509_s16 = smov 0   ;;  %s1972_s0 = inlined_call_operand.vmem [shape: f32[2,300,4], index: 0, kind: input, shape index: {}]   ;;  %s1973_s1 = inlined_call_operand.vmem [shape: f32[2,300,4], index: 1, kind: input, shape index: {}]   ;;  %s1974_s2 = inlined_call_operand.vmem [shape: f32[2,300,21], index: 2, kind: input, shape index: {}]   ;;  %s1975_s3 = inlined_call_operand.vmem [shape: s32[2,1,300], index: 3, kind: input, shape index: {}]   ;;  %s1976_s4 = inlined_call_operand.vmem [shape: f32[1,2,1,1], index: 4, kind: output, shape index: {}]  }
   0x1   :  { %s1511_s17 = smov 0   ;;  %s1513_s18 = smov 0  }
   0x2   :  { %s1515_s19 = smov 0  }
   0x3 LB: > { %s26_s20 = sadd.s32 1, %s1467_s17  ;;  %s29_s21 = sadd.s32 1, %s1471_s18  ;;  %s1475_s19 = sphi %s1515_s19, %s14_s19   ;;  %s1471_s18 = sphi %s1513_s18, %s1980_s18   ;;  %s1467_s17 = sphi %s1511_s17, %s1979_s17   ;;  %s1463_s16 = sphi %s1509_s16, %s1978_s16   ;;  %s1459_s15 = sphi %s1507_s15, %s1977_s15  }
   0x4   : > { %p27_p0 = scmp.ge.s32.totalorder %s26_s20, 2  ;;  %p1335_p1 = scmp.ge.s32.totalorder %s1475_s19, 1 }
   0x5   : > { %p334_p2 = scmp.lt.s32.totalorder %s1475_s19, 5 }
   0x6   : > { %s1982_s20 = smov (%p27_p0, %s26_s20), 0  ;;  %s1984_s21 = smov (!%p27_p0, %s29_s21), %s1471_s18 }
   0x7   : > { %p335_p3 = pnand %p1335_p1, %p334_p2  ;;  %p31_p4 = scmp.ge.s32.totalorder %s1984_s21, 2 }
   0x8   : > { %p425_p5 = scmp.lt.s32.totalorder (!%p335_p3), %s1459_s15, 1  ;;  %p432_p6 = scmp.lt.s32.totalorder (!%p335_p3), %s1463_s16, 1 }
   0x9   : > { %s1986_s21 = smov (%p31_p4, %s1984_s21), 0  ;;  %338 = sbr.rel (%p335_p3) target bundleno = 667 (0x29b), region = 36 }
   0xa   : > { %p1343_p9 = scmp.ne.s32.totalorder (!%p335_p3), %s1459_s15, 0 }
   0xe   : > { %s426_s22 = scalar_select %p425_p5, %s1459_s15, 1 }
   0xf   : > { %s1988_s16 = smov (!%p432_p6, %s1463_s16), 1 }
  0x10   : > { %s1336_s23 = sshll.u32 %s426_s22, 5  ;;  %s1342_s24 = sshll.u32 %s426_s22, 1 }
  0x11   : > { %p434_p7 = scmp.lt.s32.totalorder %s1336_s23, 37  ;;  %s1350_s25 = smul.u32 38, %s1988_s16 }
  0x12   : > { %p511_p8 = scmp.lt.s32.totalorder %s1342_s24, 2  ;;  %s1351_s26 = smul.u32 3, %s1988_s16 }
  0x13   : > { %s1990_s23 = smov (!%p434_p7, %s1336_s23), 37  ;;  %s530_s30 = scalar_lea.vmem %s1976_s4, %s1988_s16 }
  0x14   : > { %s1992_s24 = smov (!%p511_p8, %s1342_s24), 2  ;;  %s437_s27 = sadd.s32 %s1350_s25, %s1990_s23 }
  0x15   : > { %s1337_s5 = sshll.u32 %s437_s27, 3  ;;  %s1549_s6 = sadd.s32 %s1351_s26, %s1992_s24 }
  0x16   : > { %s1554_s9 = scalar_lea.vmem %s1972_s0, %s1337_s5  ;;  %s1559_s12 = scalar_lea.vmem %s1973_s1, %s1337_s5 }
  0x17   : > { %s1564_s22 = scalar_lea.vmem %s1974_s2, %s1337_s5  ;;  %s515_s24 = scalar_lea.vmem %s1975_s3, %s1549_s6 }
  0x18   : > { %534 = sbr.rel (%p1343_p9) target bundleno = 31 (0x1f), region = 40 }
  0x1d   : > { %vm535_vm0 = vcmask 0   ;;  %v1477_v0 = vmov 0.0  }
  0x1e   : > { %536 = vst.msk [vmem:[#allocation3] sm:$0x1] %vm535_vm0, %v1477_v0 }
  0x1f PF: > { %v569_v1 = vld [vmem:[%s1554_s9] sm:$0xff]  ;;  %v570_v3 = vld [vmem:[%s1554_s9 + $0x8] sm:$0xff]  ;;  %v571_v7 = vld [vmem:[%s1554_s9 + $0x10] sm:$0xff]  ;;  %s1478_s26 = smov 124   ;;  %vm665_vm1 = vcmask 171008   ;;  %vm826_vm2 = vcmask 1048544  }
  0x20   : > { %v601_v2 = vld [vmem:[%s1559_s12] sm:$0xff]  ;;  %v602_v5 = vld [vmem:[%s1559_s12 + $0x8] sm:$0xff]  ;;  %v603_v8 = vld [vmem:[%s1559_s12 + $0x10] sm:$0xff]  ;;  %s1344_s27 = sshll.u32 %s1459_s15, 8  ;;  %p1347_p10 = scmp.ne.s32.totalorder %s1459_s15, 1 }
  0x21   : > { %v633_v4 = vsub.f32 %v569_v1, %v601_v2  ;;  %v634_v6 = vsub.f32 %v570_v3, %v602_v5  ;;  %v635_v9 = vsub.f32 %v571_v7, %v603_v8  ;;  %v585_v10 = vld [vmem:[%s1554_s9 + $0x80] sm:$0xff]  ;;  %v586_v12 = vld [vmem:[%s1554_s9 + $0x88] sm:$0xff]  ;;  %v587_v14 = vld [vmem:[%s1554_s9 + $0x90] sm:$0xff] }
  0x22   : > { %v617_v11 = vld [vmem:[%s1559_s12 + $0x80] sm:$0xff]  ;;  %v618_v13 = vld [vmem:[%s1559_s12 + $0x88] sm:$0xff]  ;;  %v619_v15 = vld [vmem:[%s1559_s12 + $0x90] sm:$0xff] }
  0x23   : > { %730 = vrot.lane.b32.xlu0 %v633_v4, %s1478_s26  ;;  %732 = vrot.lane.b32.xlu1 %v634_v6, %s1478_s26  ;;  %v649_v16 = vsub.f32 %v585_v10, %v617_v11  ;;  %v650_v17 = vsub.f32 %v586_v12, %v618_v13  ;;  %v651_v18 = vsub.f32 %v587_v14, %v619_v15  ;;  %v572_v19 = vld [vmem:[%s1554_s9 + $0x18] sm:$0xff]  ;;  %v573_v23 = vld [vmem:[%s1554_s9 + $0x20] sm:$0xff] }
  0x24   : > { %734 = vrot.lane.b32.xlu2 %v635_v9, %s1478_s26  ;;  %v604_v20 = vld [vmem:[%s1559_s12 + $0x18] sm:$0xff]  ;;  %v605_v24 = vld [vmem:[%s1559_s12 + $0x20] sm:$0xff]  ;;  %v574_v30 = vld [vmem:[%s1554_s9 + $0x28] sm:$0xff] }
  0x25   : > { %v588_v21 = vld [vmem:[%s1554_s9 + $0x98] sm:$0xff]  ;;  %v636_v25 = vsub.f32 %v572_v19, %v604_v20  ;;  %v637_v27 = vsub.f32 %v573_v23, %v605_v24  ;;  %v589_v28 = vld [vmem:[%s1554_s9 + $0xa0] sm:$0xff]  ;;  %v606_v31 = vld [vmem:[%s1559_s12 + $0x28] sm:$0xff] }
  0x26   : > { %v620_v22 = vld [vmem:[%s1559_s12 + $0x98] sm:$0xff]  ;;  %v621_v29 = vld [vmem:[%s1559_s12 + $0xa0] sm:$0xff]  ;;  %v590_v32 = vld [vmem:[%s1554_s9 + $0xa8] sm:$0xff]  ;;  %v638_v35 = vsub.f32 %v574_v30, %v606_v31 }
  0x27   : > { %v652_v26 = vsub.f32 %v588_v21, %v620_v22  ;;  %v622_v33 = vld [vmem:[%s1559_s12 + $0xa8] sm:$0xff]  ;;  %v653_v34 = vsub.f32 %v589_v28, %v621_v29  ;;  %v575_v37 = vld [vmem:[%s1554_s9 + $0x30] sm:$0xff]  ;;  %v576_v41 = vld [vmem:[%s1554_s9 + $0x38] sm:$0xff] }
  0x28   : > { %v654_v36 = vsub.f32 %v590_v32, %v622_v33  ;;  %v607_v38 = vld [vmem:[%s1559_s12 + $0x30] sm:$0xff]  ;;  %v608_v42 = vld [vmem:[%s1559_s12 + $0x38] sm:$0xff]  ;;  %v577_v48 = vld [vmem:[%s1554_s9 + $0x40] sm:$0xff] }
  0x29   : > { %v591_v39 = vld [vmem:[%s1554_s9 + $0xb0] sm:$0xff]  ;;  %v639_v43 = vsub.f32 %v575_v37, %v607_v38  ;;  %v640_v45 = vsub.f32 %v576_v41, %v608_v42  ;;  %v592_v46 = vld [vmem:[%s1554_s9 + $0xb8] sm:$0xff]  ;;  %v609_v49 = vld [vmem:[%s1559_s12 + $0x40] sm:$0xff] }
  0x2a   : > { %v623_v40 = vld [vmem:[%s1559_s12 + $0xb0] sm:$0xff]  ;;  %v624_v47 = vld [vmem:[%s1559_s12 + $0xb8] sm:$0xff]  ;;  %v593_v50 = vld [vmem:[%s1554_s9 + $0xc0] sm:$0xff]  ;;  %v641_v53 = vsub.f32 %v577_v48, %v609_v49 }
  0x2b   : > { %762 = vrot.lane.b32.xlu0 %v649_v16, %s1478_s26  ;;  %764 = vrot.lane.b32.xlu1 %v650_v17, %s1478_s26  ;;  %v655_v44 = vsub.f32 %v591_v39, %v623_v40  ;;  %v625_v51 = vld [vmem:[%s1559_s12 + $0xc0] sm:$0xff]  ;;  %v656_v52 = vsub.f32 %v592_v46, %v624_v47  ;;  %v578_v55 = vld [vmem:[%s1554_s9 + $0x48] sm:$0xff] }
  0x2c   : > { %766 = vrot.lane.b32.xlu2 %v651_v18, %s1478_s26  ;;  %v657_v54 = vsub.f32 %v593_v50, %v625_v51  ;;  %v610_v56 = vld [vmem:[%s1559_s12 + $0x48] sm:$0xff]  ;;  %v579_v59 = vld [vmem:[%s1554_s9 + $0x50] sm:$0xff]  ;;  %v580_v2 = vld [vmem:[%s1554_s9 + $0x58] sm:$0xff] }
  0x2d   : > { %v594_v57 = vld [vmem:[%s1554_s9 + $0xc8] sm:$0xff]  ;;  %v611_v60 = vld [vmem:[%s1559_s12 + $0x50] sm:$0xff]  ;;  %v642_v61 = vsub.f32 %v578_v55, %v610_v56  ;;  %v612_v3 = vld [vmem:[%s1559_s12 + $0x58] sm:$0xff] }
  0x2e   : > { %v626_v58 = vld [vmem:[%s1559_s12 + $0xc8] sm:$0xff]  ;;  %v643_v63 = vsub.f32 %v579_v59, %v611_v60  ;;  %v595_v0 = vld [vmem:[%s1554_s9 + $0xd0] sm:$0xff]  ;;  %v596_v4 = vld [vmem:[%s1554_s9 + $0xd8] sm:$0xff]  ;;  %v644_v7 = vsub.f32 %v580_v2, %v612_v3 }
  0x2f   : > { %v658_v62 = vsub.f32 %v594_v57, %v626_v58  ;;  %v627_v1 = vld [vmem:[%s1559_s12 + $0xd0] sm:$0xff]  ;;  %v628_v5 = vld [vmem:[%s1559_s12 + $0xd8] sm:$0xff]  ;;  %v581_v9 = vld [vmem:[%s1554_s9 + $0x60] sm:$0xff] }
  0x30   : > { %v659_v6 = vsub.f32 %v595_v0, %v627_v1  ;;  %v660_v8 = vsub.f32 %v596_v4, %v628_v5  ;;  %v613_v10 = vld [vmem:[%s1559_s12 + $0x60] sm:$0xff]  ;;  %v582_v13 = vld [vmem:[%s1554_s9 + $0x68] sm:$0xff]  ;;  %v583_v20 = vld [vmem:[%s1554_s9 + $0x70] sm:$0xff] }
  0x31   : > { %v597_v11 = vld [vmem:[%s1554_s9 + $0xe0] sm:$0xff]  ;;  %v614_v14 = vld [vmem:[%s1559_s12 + $0x68] sm:$0xff]  ;;  %v645_v15 = vsub.f32 %v581_v9, %v613_v10  ;;  %v615_v21 = vld [vmem:[%s1559_s12 + $0x70] sm:$0xff] }
  0x32   : > { %v629_v12 = vld [vmem:[%s1559_s12 + $0xe0] sm:$0xff]  ;;  %v646_v17 = vsub.f32 %v582_v13, %v614_v14  ;;  %v598_v18 = vld [vmem:[%s1554_s9 + $0xe8] sm:$0xff]  ;;  %v599_v22 = vld [vmem:[%s1554_s9 + $0xf0] sm:$0xff] }
  0x33   : > { %736 = vrot.lane.b32.xlu0 %v636_v25, %s1478_s26  ;;  %768 = vrot.lane.b32.xlu1 %v652_v26, %s1478_s26  ;;  %v661_v16 = vsub.f32 %v597_v11, %v629_v12  ;;  %v630_v19 = vld [vmem:[%s1559_s12 + $0xe8] sm:$0xff]  ;;  %v631_v23 = vld [vmem:[%s1559_s12 + $0xf0] sm:$0xff]  ;;  %v647_v25 = vsub.f32 %v583_v20, %v615_v21 }
  0x34   : > { %738 = vrot.lane.b32.xlu2 %v637_v27, %s1478_s26  ;;  %v662_v24 = vsub.f32 %v598_v18, %v630_v19  ;;  %v663_v26 = vsub.f32 %v599_v22, %v631_v23  ;;  %v584_v27 = vld [vmem:[%s1554_s9 + $0x78] sm:$0xff]  ;;  %v537_v30 = vld [vmem:[%s1564_s22] sm:$0xff]  ;;  %v539_v31 = vld [vmem:[%s1564_s22 + $0x10] sm:$0xff] }
  0x35   : > { %v616_v28 = vld [vmem:[%s1559_s12 + $0x78] sm:$0xff]  ;;  %666 = vst.msk [vmem:[#allocation2] sm:$0xff] %vm665_vm1, %v537_v30  ;;  %v538_v32 = vld [vmem:[%s1564_s22 + $0x8] sm:$0xff]  ;;  %v553_v33 = vld [vmem:[%s1564_s22 + $0x80] sm:$0xff] }
  0x36   : > { %v648_v29 = vsub.f32 %v584_v27, %v616_v28  ;;  %668 = vst.msk [vmem:[#allocation2 + $0x10] sm:$0xff] %vm665_vm1, %v539_v31  ;;  %v554_v39 = vld [vmem:[%s1564_s22 + $0x88] sm:$0xff]  ;;  %v541_v40 = vld [vmem:[%s1564_s22 + $0x20] sm:$0xff]  ;;  %v540_v41 = vld [vmem:[%s1564_s22 + $0x18] sm:$0xff] }
  0x37   : > { %667 = vst.msk [vmem:[#allocation2 + $0x8] sm:$0xff] %vm665_vm1, %v538_v32  ;;  %v544_v48 = vld [vmem:[%s1564_s22 + $0x38] sm:$0xff]  ;;  %v542_v50 = vld [vmem:[%s1564_s22 + $0x28] sm:$0xff]  ;;  %v557_v51 = vld [vmem:[%s1564_s22 + $0xa0] sm:$0xff] }
  0x38   : > { %682 = vst.msk [vmem:[#allocation2 + $0x80] sm:$0xff] %vm665_vm1, %v553_v33  ;;  %v561_v55 = vld [vmem:[%s1564_s22 + $0xc0] sm:$0xff]  ;;  %v543_v57 = vld [vmem:[%s1564_s22 + $0x30] sm:$0xff]  ;;  %v560_v1 = vld [vmem:[%s1564_s22 + $0xb8] sm:$0xff] }
  0x39   : > { %683 = vst.msk [vmem:[#allocation2 + $0x88] sm:$0xff] %vm665_vm1, %v554_v39  ;;  %v559_v0 = vld [vmem:[%s1564_s22 + $0xb0] sm:$0xff]  ;;  %v546_v9 = vld [vmem:[%s1564_s22 + $0x48] sm:$0xff] }
  0x3a   : > { %670 = vst.msk [vmem:[#allocation2 + $0x20] sm:$0xff] %vm665_vm1, %v541_v40  ;;  %v550_v14 = vld [vmem:[%s1564_s22 + $0x68] sm:$0xff]  ;;  %v567_v21 = vld [vmem:[%s1564_s22 + $0xf0] sm:$0xff] }
  0x3b   : > { %770 = vrot.lane.b32.xlu0 %v653_v34, %s1478_s26  ;;  %740 = vrot.lane.b32.xlu1 %v638_v35, %s1478_s26  ;;  %v600_v34 = vld [vmem:[%s1554_s9 + $0xf8] sm:$0xff]  ;;  %669 = vst.msk [vmem:[#allocation2 + $0x18] sm:$0xff] %vm665_vm1, %v540_v41  ;;  %v562_v23 = vld [vmem:[%s1564_s22 + $0xc8] sm:$0xff] }
  0x3c   : > { %772 = vrot.lane.b32.xlu2 %v654_v36, %s1478_s26  ;;  %v632_v35 = vld [vmem:[%s1559_s12 + $0xf8] sm:$0xff]  ;;  %v555_v36 = vld [vmem:[%s1564_s22 + $0x90] sm:$0xff]  ;;  %673 = vst.msk [vmem:[#allocation2 + $0x38] sm:$0xff] %vm665_vm1, %v544_v48  ;;  %v566_v31 = vld [vmem:[%s1564_s22 + $0xe8] sm:$0xff] }
  0x3d   : > { %v664_v38 = vsub.f32 %v600_v34, %v632_v35  ;;  %684 = vst.msk [vmem:[#allocation2 + $0x90] sm:$0xff] %vm665_vm1, %v555_v36  ;;  %v552_v36 = vld [vmem:[%s1564_s22 + $0x78] sm:$0xff]  ;;  %v565_v41 = vld [vmem:[%s1564_s22 + $0xe0] sm:$0xff] }
  0x3e   : > { %671 = vst.msk [vmem:[#allocation2 + $0x28] sm:$0xff] %vm665_vm1, %v542_v50 }
  0x3f   : > { %686 = vst.msk [vmem:[#allocation2 + $0xa0] sm:$0xff] %vm665_vm1, %v557_v51 }
  0x40   : > { %690 = vst.msk [vmem:[#allocation2 + $0xc0] sm:$0xff] %vm665_vm1, %v561_v55 }
  0x41   : > { %672 = vst.msk [vmem:[#allocation2 + $0x30] sm:$0xff] %vm665_vm1, %v543_v57 }
  0x42   : > { %688 = vst.msk [vmem:[#allocation2 + $0xb0] sm:$0xff] %vm665_vm1, %v559_v0 }
  0x43   : > { %742 = vrot.lane.b32.xlu0 %v639_v43, %s1478_s26  ;;  %774 = vrot.lane.b32.xlu1 %v655_v44, %s1478_s26  ;;  %v558_v43 = vld [vmem:[%s1564_s22 + $0xa8] sm:$0xff]  ;;  %v556_v44 = vld [vmem:[%s1564_s22 + $0x98] sm:$0xff]  ;;  %689 = vst.msk [vmem:[#allocation2 + $0xb8] sm:$0xff] %vm665_vm1, %v560_v1  ;;  %v958_v1 = vlaneseq }
  0x44   : > { %744 = vrot.lane.b32.xlu2 %v640_v45, %s1478_s26  ;;  %687 = vst.msk [vmem:[#allocation2 + $0xa8] sm:$0xff] %vm665_vm1, %v558_v43 }
  0x45   : > { %685 = vst.msk [vmem:[#allocation2 + $0x98] sm:$0xff] %vm665_vm1, %v556_v44 }
  0x46   : > { %675 = vst.msk [vmem:[#allocation2 + $0x48] sm:$0xff] %vm665_vm1, %v546_v9 }
  0x47   : > { %679 = vst.msk [vmem:[#allocation2 + $0x68] sm:$0xff] %vm665_vm1, %v550_v14 }
  0x48   : > { %696 = vst.msk [vmem:[#allocation2 + $0xf0] sm:$0xff] %vm665_vm1, %v567_v21 }
  0x49   : > { %691 = vst.msk [vmem:[#allocation2 + $0xc8] sm:$0xff] %vm665_vm1, %v562_v23 }
  0x4a   : > { %695 = vst.msk [vmem:[#allocation2 + $0xe8] sm:$0xff] %vm665_vm1, %v566_v31 }
  0x4b   : > { %776 = vrot.lane.b32.xlu0 %v656_v52, %s1478_s26  ;;  %746 = vrot.lane.b32.xlu1 %v641_v53, %s1478_s26  ;;  %681 = vst.msk [vmem:[#allocation2 + $0x78] sm:$0xff] %vm665_vm1, %v552_v36 }
  0x4c   : > { %778 = vrot.lane.b32.xlu2 %v657_v54, %s1478_s26  ;;  %694 = vst.msk [vmem:[#allocation2 + $0xe0] sm:$0xff] %vm665_vm1, %v565_v41 }
  0x53   : > { %748 = vrot.lane.b32.xlu0 %v642_v61, %s1478_s26  ;;  %780 = vrot.lane.b32.xlu1 %v658_v62, %s1478_s26  ;;  %v547_v62 = vld [vmem:[%s1564_s22 + $0x50] sm:$0xff] }
  0x54   : > { %750 = vrot.lane.b32.xlu2 %v643_v63, %s1478_s26  ;;  %676 = vst.msk [vmem:[#allocation2 + $0x50] sm:$0xff] %vm665_vm1, %v547_v62 }
  0x5b   : > { %782 = vrot.lane.b32.xlu0 %v659_v6, %s1478_s26  ;;  %752 = vrot.lane.b32.xlu1 %v644_v7, %s1478_s26  ;;  %v564_v6 = vld [vmem:[%s1564_s22 + $0xd8] sm:$0xff] }
  0x5c   : > { %784 = vrot.lane.b32.xlu2 %v660_v8, %s1478_s26  ;;  %v545_v8 = vld [vmem:[%s1564_s22 + $0x40] sm:$0xff]  ;;  %693 = vst.msk [vmem:[#allocation2 + $0xd8] sm:$0xff] %vm665_vm1, %v564_v6 }
  0x5d   : > { %674 = vst.msk [vmem:[#allocation2 + $0x40] sm:$0xff] %vm665_vm1, %v545_v8 }
  0x63   : > { %754 = vrot.lane.b32.xlu0 %v645_v15, %s1478_s26  ;;  %786 = vrot.lane.b32.xlu1 %v661_v16, %s1478_s26  ;;  %v563_v16 = vld [vmem:[%s1564_s22 + $0xd0] sm:$0xff] }
  0x64   : > { %756 = vrot.lane.b32.xlu2 %v646_v17, %s1478_s26  ;;  %692 = vst.msk [vmem:[#allocation2 + $0xd0] sm:$0xff] %vm665_vm1, %v563_v16 }
  0x6b   : > { %788 = vrot.lane.b32.xlu0 %v662_v24, %s1478_s26  ;;  %758 = vrot.lane.b32.xlu1 %v647_v25, %s1478_s26  ;;  %v549_v24 = vld [vmem:[%s1564_s22 + $0x60] sm:$0xff] }
  0x6c   : > { %790 = vrot.lane.b32.xlu2 %v663_v26, %s1478_s26  ;;  %678 = vst.msk [vmem:[#allocation2 + $0x60] sm:$0xff] %vm665_vm1, %v549_v24 }
  0x73   : > { %760 = vrot.lane.b32.xlu0 %v648_v29, %s1478_s26  ;;  %792 = vrot.lane.b32.xlu1 %v664_v38, %s1478_s26  ;;  %v548_v29 = vld [vmem:[%s1564_s22 + $0x58] sm:$0xff] }
  0x74   : > { %677 = vst.msk [vmem:[#allocation2 + $0x58] sm:$0xff] %vm665_vm1, %v548_v29  ;;  %v1799_v29 = vshrl.u32 %v958_v1, 7 }
  0x7e   : > { %v735_v37 = vpop.permute.xlu2 %734 }
  0x7f   : > { %829 = vst.msk [vmem:[#allocation2 + $0x10] sm:$0xff] %vm826_vm2, %v735_v37 }
  0x86   : > { %v767_v42 = vpop.permute.xlu2 %766  ;;  %v861_v3 = vld [vmem:[#allocation2 + $0x10] sm:$0xff] }
  0x87   : > { %845 = vst.msk [vmem:[#allocation2 + $0x90] sm:$0xff] %vm826_vm2, %v767_v42 }
  0x8e   : > { %v739_v45 = vpop.permute.xlu2 %738  ;;  %v877_v11 = vld [vmem:[#allocation2 + $0x90] sm:$0xff] }
  0x8f   : > { %831 = vst.msk [vmem:[#allocation2 + $0x20] sm:$0xff] %vm826_vm2, %v739_v45 }
  0x95   : > { %v731_v46 = vpop.permute.xlu0 %730  ;;  %v733_v47 = vpop.permute.xlu1 %732 }
  0x96   : > { %827 = vst.msk [vmem:[#allocation2] sm:$0xff] %vm826_vm2, %v731_v46  ;;  %v773_v49 = vpop.permute.xlu2 %772  ;;  %v863_v18 = vld [vmem:[#allocation2 + $0x20] sm:$0xff]  ;;  %v551_v46 = vld [vmem:[%s1564_s22 + $0x70] sm:$0xff] }
  0x97   : > { %828 = vst.msk [vmem:[#allocation2 + $0x8] sm:$0xff] %vm826_vm2, %v733_v47 }
  0x98   : > { %848 = vst.msk [vmem:[#allocation2 + $0xa8] sm:$0xff] %vm826_vm2, %v773_v49 }
  0x99   : > { %680 = vst.msk [vmem:[#allocation2 + $0x70] sm:$0xff] %vm665_vm1, %v551_v46 }
  0x9d   : > { %v763_v52 = vpop.permute.xlu0 %762  ;;  %v859_v53 = vld [vmem:[#allocation2] sm:$0xff]  ;;  %v765_v54 = vpop.permute.xlu1 %764 }
  0x9e   : > { %843 = vst.msk [vmem:[#allocation2 + $0x80] sm:$0xff] %vm826_vm2, %v763_v52  ;;  %891 = vxpose.xlu2.b32.start [1/16] %v859_v53, 128  ;;  %v745_v56 = vpop.permute.xlu2 %744  ;;  %v860_v58 = vld [vmem:[#allocation2 + $0x8] sm:$0xff]  ;;  %v568_v52 = vld [vmem:[%s1564_s22 + $0xf8] sm:$0xff] }
  0x9f   : > { %844 = vst.msk [vmem:[#allocation2 + $0x88] sm:$0xff] %vm826_vm2, %v765_v54  ;;  %v880_v33 = vld [vmem:[#allocation2 + $0xa8] sm:$0xff] }
  0xa0   : > { %834 = vst.msk [vmem:[#allocation2 + $0x38] sm:$0xff] %vm826_vm2, %v745_v56 }
  0xa1   : > { %697 = vst.msk [vmem:[#allocation2 + $0xf8] sm:$0xff] %vm665_vm1, %v568_v52 }
  0xa5   : > { %v875_v59 = vld [vmem:[#allocation2 + $0x80] sm:$0xff]  ;;  %v737_v60 = vpop.permute.xlu0 %736  ;;  %v769_v61 = vpop.permute.xlu1 %768 }
  0xa6   : > { %923 = vxpose.xlu0.b32.start [1/16] %v875_v59, 128  ;;  %892 = vxpose.xlu2.b32.cont [2/16] %v860_v58, 128  ;;  %830 = vst.msk [vmem:[#allocation2 + $0x18] sm:$0xff] %vm826_vm2, %v737_v60  ;;  %v779_v63 = vpop.permute.xlu2 %778  ;;  %v876_v2 = vld [vmem:[#allocation2 + $0x88] sm:$0xff] }
  0xa7   : > { %846 = vst.msk [vmem:[#allocation2 + $0x98] sm:$0xff] %vm826_vm2, %v769_v61  ;;  %v866_v38 = vld [vmem:[#allocation2 + $0x38] sm:$0xff] }
  0xa8   : > { %851 = vst.msk [vmem:[#allocation2 + $0xc0] sm:$0xff] %vm826_vm2, %v779_v63 }
  0xad   : > { %v771_v4 = vpop.permute.xlu0 %770  ;;  %v741_v5 = vpop.permute.xlu1 %740  ;;  %v862_v10 = vld [vmem:[#allocation2 + $0x18] sm:$0xff] }
  0xae   : > { %924 = vxpose.xlu0.b32.cont [2/16] %v876_v2, 128  ;;  %893 = vxpose.xlu2.b32.cont [3/16] %v861_v3, 128  ;;  %847 = vst.msk [vmem:[#allocation2 + $0xa0] sm:$0xff] %vm826_vm2, %v771_v4  ;;  %v751_v7 = vpop.permute.xlu2 %750  ;;  %v878_v17 = vld [vmem:[#allocation2 + $0x98] sm:$0xff]  ;;  %v959_v2 = vand.u32 127, %v958_v1  ;;  %v961_v3 = vstv %s1344_s27 }
  0xaf   : > { %832 = vst.msk [vmem:[#allocation2 + $0x28] sm:$0xff] %vm826_vm2, %v741_v5  ;;  %v883_v47 = vld [vmem:[#allocation2 + $0xc0] sm:$0xff] }
  0xb0   : > { %837 = vst.msk [vmem:[#allocation2 + $0x50] sm:$0xff] %vm826_vm2, %v751_v7  ;;  %v1764_v4 = vadd.s32 %v961_v3, %v959_v2 }
  0xb2   : > { %vm964_vm3 = vcmp.lt.s32.totalorder %v1764_v4, 300 }
  0xb5   : > { %v743_v12 = vpop.permute.xlu0 %742  ;;  %v775_v13 = vpop.permute.xlu1 %774  ;;  %v879_v25 = vld [vmem:[#allocation2 + $0xa0] sm:$0xff] }
  0xb6   : > { %925 = vxpose.xlu0.b32.cont [3/16] %v877_v11, 128  ;;  %894 = vxpose.xlu2.b32.cont [4/16] %v862_v10, 128  ;;  %833 = vst.msk [vmem:[#allocation2 + $0x30] sm:$0xff] %vm826_vm2, %v743_v12  ;;  %v785_v15 = vpop.permute.xlu2 %784  ;;  %v864_v26 = vld [vmem:[#allocation2 + $0x28] sm:$0xff]  ;;  %v960_v12 = vadd.s32 128, %v959_v2 }
  0xb7   : > { %849 = vst.msk [vmem:[#allocation2 + $0xb0] sm:$0xff] %vm826_vm2, %v775_v13  ;;  %v869_v51 = vld [vmem:[#allocation2 + $0x50] sm:$0xff] }
  0xb8   : > { %854 = vst.msk [vmem:[#allocation2 + $0xd8] sm:$0xff] %vm826_vm2, %v785_v15  ;;  %v1777_v15 = vadd.s32 %v961_v3, %v960_v12 }
  0xba   : > { %vm965_vm4 = vcmp.lt.s32.totalorder %v1777_v15, 300 }
  0xbd   : > { %v777_v19 = vpop.permute.xlu0 %776  ;;  %v747_v20 = vpop.permute.xlu1 %746  ;;  %v865_v32 = vld [vmem:[#allocation2 + $0x30] sm:$0xff] }
  0xbe   : > { %926 = vxpose.xlu0.b32.cont [4/16] %v878_v17, 128  ;;  %895 = vxpose.xlu2.b32.cont [5/16] %v863_v18, 128  ;;  %850 = vst.msk [vmem:[#allocation2 + $0xb8] sm:$0xff] %vm826_vm2, %v777_v19  ;;  %v757_v22 = vpop.permute.xlu2 %756  ;;  %v881_v37 = vld [vmem:[#allocation2 + $0xb0] sm:$0xff] }
  0xbf   : > { %835 = vst.msk [vmem:[#allocation2 + $0x40] sm:$0xff] %vm826_vm2, %v747_v20  ;;  %v886_v56 = vld [vmem:[#allocation2 + $0xd8] sm:$0xff] }
  0xc0   : > { %840 = vst.msk [vmem:[#allocation2 + $0x68] sm:$0xff] %vm826_vm2, %v757_v22  ;;  %v1790_v22 = vld [vmem:[%s515_s24] sm:$0x3] }
  0xc5   : > { %v749_v27 = vpop.permute.xlu0 %748  ;;  %v781_v28 = vpop.permute.xlu1 %780  ;;  %v882_v43 = vld [vmem:[#allocation2 + $0xb8] sm:$0xff] }
  0xc6   : > { %927 = vxpose.xlu0.b32.cont [5/16] %v879_v25, 128  ;;  %896 = vxpose.xlu2.b32.cont [6/16] %v864_v26, 128  ;;  %836 = vst.msk [vmem:[#allocation2 + $0x48] sm:$0xff] %vm826_vm2, %v749_v27  ;;  %v791_v30 = vpop.permute.xlu2 %790  ;;  %v867_v42 = vld [vmem:[#allocation2 + $0x40] sm:$0xff] }
  0xc7   : > { %852 = vst.msk [vmem:[#allocation2 + $0xc8] sm:$0xff] %vm826_vm2, %v781_v28  ;;  %v872_v59 = vld [vmem:[#allocation2 + $0x68] sm:$0xff] }
  0xc8   : > { %857 = vst.msk [vmem:[#allocation2 + $0xf0] sm:$0xff] %vm826_vm2, %v791_v30  ;;  %v1802_v30 = vperm.slane %v1790_v22, 0 }
  0xca   : > { %vm1028_vm5 = vcmp.eq.s32.totalorder %v1799_v29, %v1802_v30 }
  0xcd   : > { %v783_v34 = vpop.permute.xlu0 %782  ;;  %v753_v35 = vpop.permute.xlu1 %752  ;;  %v868_v48 = vld [vmem:[#allocation2 + $0x48] sm:$0xff] }
  0xce   : > { %928 = vxpose.xlu0.b32.cont [6/16] %v880_v33, 128  ;;  %897 = vxpose.xlu2.b32.cont [7/16] %v865_v32, 128  ;;  %853 = vst.msk [vmem:[#allocation2 + $0xd0] sm:$0xff] %vm826_vm2, %v783_v34  ;;  %v884_v50 = vld [vmem:[#allocation2 + $0xc8] sm:$0xff] }
  0xcf   : > { %838 = vst.msk [vmem:[#allocation2 + $0x58] sm:$0xff] %vm826_vm2, %v753_v35  ;;  %v889_v62 = vld [vmem:[#allocation2 + $0xf0] sm:$0xff]  ;;  %v1806_v35 = vadd.s32 8, %v1799_v29 }
  0xd1   : > { %vm1030_vm6 = vcmp.eq.s32.totalorder %v1806_v35, %v1802_v30 }
  0xd5   : > { %v755_v39 = vpop.permute.xlu0 %754  ;;  %v787_v40 = vpop.permute.xlu1 %786  ;;  %v885_v55 = vld [vmem:[#allocation2 + $0xd0] sm:$0xff] }
  0xd6   : > { %929 = vxpose.xlu0.b32.cont [7/16] %v881_v37, 128  ;;  %898 = vxpose.xlu2.b32.cont [8/16] %v866_v38, 128  ;;  %839 = vst.msk [vmem:[#allocation2 + $0x60] sm:$0xff] %vm826_vm2, %v755_v39  ;;  %v870_v53 = vld [vmem:[#allocation2 + $0x58] sm:$0xff]  ;;  %v1479_v38 = vmov 0.25  }
  0xd7   : > { %855 = vst.msk [vmem:[#allocation2 + $0xe0] sm:$0xff] %vm826_vm2, %v787_v40  ;;  %v1136_v39 = vsel %vm1028_vm5, 0.75, %v1479_v38  ;;  %v1816_v40 = vperm.slane %v1790_v22, 1 }
  0xd9   : > { %vm1029_vm8 = vcmp.eq.s32.totalorder %v1799_v29, %v1816_v40  ;;  %vm1031_vm10 = vcmp.eq.s32.totalorder %v1806_v35, %v1816_v40 }
  0xdd   : > { %v789_v44 = vpop.permute.xlu0 %788  ;;  %v759_v45 = vpop.permute.xlu1 %758  ;;  %v871_v57 = vld [vmem:[#allocation2 + $0x60] sm:$0xff] }
  0xde   : > { %930 = vxpose.xlu0.b32.cont [8/16] %v882_v43, 128  ;;  %899 = vxpose.xlu2.b32.cont [9/16] %v867_v42, 128  ;;  %856 = vst.msk [vmem:[#allocation2 + $0xe8] sm:$0xff] %vm826_vm2, %v789_v44  ;;  %v887_v58 = vld [vmem:[#allocation2 + $0xe0] sm:$0xff]  ;;  %v1480_v42 = vmov 0.0  }
  0xdf   : > { %841 = vst.msk [vmem:[#allocation2 + $0x70] sm:$0xff] %vm826_vm2, %v759_v45  ;;  %v1824_v43 = vsel %vm964_vm3, 1.0, %v1480_v42  ;;  %v1828_v45 = vadd.s32 16, %v1799_v29 }
  0xe1   : > { %vm1032_vm9 = vcmp.eq.s32.totalorder %v1828_v45, %v1802_v30 }
  0xe5   : > { %v761_v49 = vpop.permute.xlu0 %760  ;;  %v793_v54 = vpop.permute.xlu1 %792  ;;  %v888_v61 = vld [vmem:[#allocation2 + $0xe8] sm:$0xff] }
  0xe6   : > { %931 = vxpose.xlu0.b32.cont [9/16] %v883_v47, 128  ;;  %900 = vxpose.xlu2.b32.cont [10/16] %v868_v48, 128  ;;  %842 = vst.msk [vmem:[#allocation2 + $0x78] sm:$0xff] %vm826_vm2, %v761_v49  ;;  %v873_v60 = vld [vmem:[#allocation2 + $0x70] sm:$0xff] }
  0xe7   : > { %858 = vst.msk [vmem:[#allocation2 + $0xf8] sm:$0xff] %vm826_vm2, %v793_v54  ;;  %v1138_v54 = vsel %vm1030_vm6, 0.75, %v1479_v38 }
  0xed   : > { %v874_v63 = vld [vmem:[#allocation2 + $0x78] sm:$0xff] }
  0xee   : > { %932 = vxpose.xlu0.b32.cont [10/16] %v884_v50, 128  ;;  %901 = vxpose.xlu2.b32.cont [11/16] %v869_v51, 128  ;;  %v890_v0 = vld [vmem:[#allocation2 + $0xf8] sm:$0xff] }
  0xf6   : > { %933 = vxpose.xlu0.b32.cont [11/16] %v885_v55, 128  ;;  %902 = vxpose.xlu2.b32.cont [12/16] %v870_v53, 128  ;;  %v1841_v53 = vmul.f32 %v1824_v43, %v1136_v39 }
  0xfe   : > { %934 = vxpose.xlu0.b32.cont [12/16] %v886_v56, 128  ;;  %903 = vxpose.xlu2.b32.cont [13/16] %v871_v57, 128 }
 0x106   : > { %935 = vxpose.xlu0.b32.cont [13/16] %v887_v58, 128  ;;  %904 = vxpose.xlu2.b32.cont [14/16] %v872_v59, 128 }
 0x10e   : > { %936 = vxpose.xlu0.b32.cont [14/16] %v888_v61, 128  ;;  %905 = vxpose.xlu2.b32.cont [15/16] %v873_v60, 128 }
 0x116   : > { %937 = vxpose.xlu0.b32.cont [15/16] %v889_v62, 128  ;;  %906 = vxpose.xlu2.b32.end [16/16] %v874_v63, 128 }
 0x11e   : > { %938 = vxpose.xlu0.b32.end [16/16] %v890_v0, 128 }
 0x137   : > { %v907_v5 = vpop.trf.xlu2 }
 0x138   : > { %v1769_v6 = vsel %vm964_vm3, %v907_v5, 0.0  ;;  %v1137_v5 = vsel %vm1029_vm8, 0.75, %v1479_v38 }
 0x139   : > { %v1034_v7 = vand.u32 2147483647, %v1769_v6  ;;  %v1088_v34 = vsub.f32 0.0, %v1769_v6  ;;  %v1082_v44 = vmax.f32 %v1769_v6, 0.0  ;;  %vm1112_vm7 = vcmp.lt.f32.partialorder %v1769_v6, 0.0 }
 0x13a   : > { %vm1118_vm11 = vmxor %vm1028_vm5, %vm1112_vm7  ;;  %vm1171_vm7 = vcmask 1044480  }
 0x13b   : > { %v1040_v8 = vsub.f32 0.0, %v1034_v7  ;;  %v1094_v48 = vsel %vm1028_vm5, %v1088_v34, 0.0  ;;  %v1864_v7 = vsel %vm965_vm4, 1.0, %v1480_v42 }
 0x13c   : > { %v1100_v57 = vadd.f32 %v1094_v48, %v1082_v44 }
 0x13d   : > { %v1046_v10 = vmul.f32 1.442695, %v1040_v8 }
 0x13f   : > { %v908_v9 = vpop.trf.xlu2  ;;  %1401 = vpow2.f32 %v1046_v10 }
 0x140   : > { %v1774_v11 = vsel %vm964_vm3, %v908_v9, 0.0 }
 0x141   : > { %v1036_v13 = vand.u32 2147483647, %v1774_v11  ;;  %v1090_v49 = vsub.f32 0.0, %v1774_v11  ;;  %v1084_v60 = vmax.f32 %v1774_v11, 0.0  ;;  %vm1114_vm12 = vcmp.lt.f32.partialorder %v1774_v11, 0.0 }
 0x142   : > { %vm1120_vm15 = vmxor %vm1030_vm6, %vm1114_vm12 }
 0x143   : > { %v1042_v14 = vsub.f32 0.0, %v1036_v13  ;;  %v1096_v0 = vsel %vm1030_vm6, %v1090_v49, 0.0  ;;  %vm1033_vm6 = vcmp.eq.s32.totalorder %v1828_v45, %v1816_v40 }
 0x145   : > { %v1050_v16 = vmul.f32 1.442695, %v1042_v14  ;;  %v1402_v20 = vpop.eup %1401  ;;  %v1146_v14 = vmul.f32 %v1824_v43, %v1138_v54 }
 0x146   : > { %v1058_v26 = vadd.f32 1.0, %v1402_v20 }
 0x147   : > { %v909_v17 = vpop.trf.xlu2  ;;  %1403 = vpow2.f32 %v1050_v16  ;;  %v1102_v16 = vadd.f32 %v1096_v0, %v1084_v60 }
 0x148   : > { %v1781_v18 = vsel %vm964_vm3, %v909_v17, 0.0 }
 0x149   : > { %v1038_v19 = vand.u32 2147483647, %v1781_v18  ;;  %v1092_v61 = vsub.f32 0.0, %v1781_v18  ;;  %v1086_v12 = vmax.f32 %v1781_v18, 0.0  ;;  %vm1116_vm13 = vcmp.lt.f32.partialorder %v1781_v18, 0.0 }
 0x14a   : > { %v939_v21 = vpop.trf.xlu0  ;;  %vm1122_vm1 = vmxor %vm1032_vm9, %vm1116_vm13 }
 0x14b   : > { %v1044_v23 = vsub.f32 0.0, %v1038_v19  ;;  %v1794_v24 = vsel %vm965_vm4, %v939_v21, 0.0  ;;  %v1098_v17 = vsel %vm1032_vm9, %v1092_v61, 0.0  ;;  %v1139_v61 = vsel %vm1031_vm10, 0.75, %v1479_v38 }
 0x14c   : > { %v1035_v25 = vand.u32 2147483647, %v1794_v24  ;;  %v1089_v1 = vsub.f32 0.0, %v1794_v24  ;;  %v1083_v19 = vmax.f32 %v1794_v24, 0.0  ;;  %vm1113_vm14 = vcmp.lt.f32.partialorder %v1794_v24, 0.0 }
 0x14d   : > { %v1054_v27 = vmul.f32 1.442695, %v1044_v23  ;;  %v1797_v28 = vpop.eup %1403  ;;  %vm1119_vm0 = vmxor %vm1029_vm8, %vm1113_vm14 }
 0x14e   : > { %v1041_v31 = vsub.f32 0.0, %v1035_v25  ;;  %v1060_v36 = vadd.f32 1.0, %v1797_v28  ;;  %v1095_v6 = vsel %vm1029_vm8, %v1089_v1, 0.0 }
 0x14f   : > { %1405 = vpow2.f32 %v1054_v27  ;;  %v910_v32 = vpop.trf.xlu2 }
 0x150   : > { %v1048_v33 = vmul.f32 1.442695, %v1041_v31  ;;  %1407 = vrcp.f32 %v1058_v26  ;;  %v1140_v31 = vsel %vm1032_vm9, 0.75, %v1479_v38  ;;  %v1145_v32 = vmul.f32 %v1864_v7, %v1137_v5 }
 0x151   : > { %v1148_v1 = vmul.f32 %v1824_v43, %v1140_v31 }
 0x152   : > { %1409 = vpow2.f32 %v1048_v33  ;;  %v940_v37 = vpop.trf.xlu0 }
 0x153   : > { %1411 = vlog2.f32 %v1058_v26  ;;  %v1820_v41 = vsel %vm965_vm4, %v940_v37, 0.0  ;;  %v1104_v37 = vadd.f32 %v1098_v17, %v1086_v12  ;;  %v1147_v12 = vmul.f32 %v1864_v7, %v1139_v61 }
 0x154   : > { %v1037_v46 = vand.u32 2147483647, %v1820_v41  ;;  %1413 = vlog2.f32 %v1060_v36  ;;  %vm1115_vm2 = vcmp.lt.f32.partialorder %v1820_v41, 0.0 }
 0x155   : > { %v1831_v47 = vpop.eup %1405  ;;  %1415 = vrcp.f32 %v1060_v36  ;;  %vm1121_vm5 = vmxor %vm1031_vm10, %vm1115_vm2 }
 0x156   : > { %v1062_v50 = vadd.f32 1.0, %v1831_v47  ;;  %v1043_v51 = vsub.f32 0.0, %v1037_v46  ;;  %v1408_v52 = vpop.eup %1407  ;;  %v1101_v46 = vadd.f32 %v1095_v6, %v1083_v19 }
 0x157   : > { %v911_v55 = vpop.trf.xlu2  ;;  %v1124_v63 = vmul.f32 %v1408_v52, %v1402_v20 }
 0x158   : > { %v1410_v56 = vpop.eup %1409  ;;  %1417 = vlog2.f32 %v1062_v50  ;;  %v1052_v58 = vmul.f32 1.442695, %v1043_v51  ;;  %v1091_v51 = vsub.f32 0.0, %v1820_v41 }
 0x159   : > { %v1412_v59 = vpop.eup %1411  ;;  %1419 = vrcp.f32 %v1062_v50  ;;  %v1059_v62 = vadd.f32 1.0, %v1410_v56  ;;  %v1130_v21 = vsel %vm1118_vm11, %v1124_v63, %v1408_v52 }
 0x15a   : > { %1421 = vpow2.f32 %v1052_v58  ;;  %v941_v2 = vpop.trf.xlu0  ;;  %v1414_v3 = vpop.eup %1413  ;;  %v1065_v10 = vmul.f32 0.6931472, %v1412_v59  ;;  %v1150_v44 = vmul.f32 %v1130_v21, %v1130_v21  ;;  %v1097_v24 = vsel %vm1031_vm10, %v1091_v51, 0.0 }
 0x15b   : > { %1423 = vlog2.f32 %v1059_v62  ;;  %v1868_v8 = vsel %vm965_vm4, %v941_v2, 0.0  ;;  %v1416_v9 = vpop.eup %1415  ;;  %v1069_v23 = vmul.f32 0.6931472, %v1414_v3  ;;  %vm967_vm10 = vcmp.gt.s32.totalorder %v1790_v22, 0 }
 0x15c   : > { %1425 = vrcp.f32 %v1059_v62  ;;  %v1039_v13 = vand.u32 2147483647, %v1868_v8  ;;  %v1126_v27 = vmul.f32 %v1416_v9, %v1797_v28  ;;  %v1106_v36 = vadd.f32 %v1100_v57, %v1065_v10 }
 0x15d   : > { %v1108_v49 = vadd.f32 %v1102_v16, %v1069_v23  ;;  %v1093_v6 = vsub.f32 0.0, %v1868_v8  ;;  %v1087_v31 = vmax.f32 %v1868_v8, 0.0  ;;  %vm1117_vm8 = vcmp.lt.f32.partialorder %v1868_v8, 0.0 }
 0x15e   : > { %v1418_v20 = vpop.eup %1417  ;;  %v1045_v25 = vsub.f32 0.0, %v1039_v13  ;;  %v1132_v54 = vsel %vm1120_vm15, %v1126_v27, %v1416_v9  ;;  %v1156_v58 = vmul.f32 %v1841_v53, %v1106_v36  ;;  %vm1123_vm9 = vmxor %vm1033_vm6, %vm1117_vm8 }
 0x15f   : > { %v1420_v26 = vpop.eup %1419  ;;  %v912_v33 = vpop.trf.xlu2  ;;  %v1073_v55 = vmul.f32 0.6931472, %v1418_v20  ;;  %v1152_v62 = vmul.f32 %v1132_v54, %v1132_v54  ;;  %v1158_v53 = vmul.f32 %v1146_v14, %v1108_v49  ;;  %v1099_v35 = vsel %vm1033_vm6, %v1093_v6, 0.0 }
 0x160   : > { %v1422_v34 = vpop.eup %1421  ;;  %v1056_v39 = vmul.f32 1.442695, %v1045_v25  ;;  %v1128_v59 = vmul.f32 %v1420_v26, %v1831_v47  ;;  %v1162_v3 = vmul.f32 %v1156_v58, %v1150_v44 }
 0x161   : > { %v1424_v42 = vpop.eup %1423  ;;  %v1061_v28 = vadd.f32 1.0, %v1422_v34  ;;  %v1110_v0 = vadd.f32 %v1104_v37, %v1073_v55  ;;  %v1164_v17 = vmul.f32 %v1158_v53, %v1152_v62 }
 0x162   : > { %v1426_v48 = vpop.eup %1425  ;;  %v1067_v50 = vmul.f32 0.6931472, %v1424_v42  ;;  %1427 = vpow2.f32 %v1056_v39  ;;  %v942_v52 = vpop.trf.xlu0  ;;  %v1134_v5 = vsel %vm1122_vm1, %v1128_v59, %v1420_v26 }
 0x163   : > { %v1125_v57 = vmul.f32 %v1426_v48, %v1410_v56  ;;  %1429 = vlog2.f32 %v1061_v28  ;;  %v1085_v56 = vmax.f32 %v1820_v41, 0.0  ;;  %v1154_v20 = vmul.f32 %v1134_v5, %v1134_v5 }
 0x164   : > { %v1107_v60 = vadd.f32 %v1101_v46, %v1067_v50  ;;  %1431 = vrcp.f32 %v1061_v28  ;;  %v1160_v43 = vmul.f32 %v1148_v1, %v1110_v0  ;;  %v1105_v28 = vadd.f32 %v1099_v35, %v1087_v31 }
 0x165   : > { %v1131_v11 = vsel %vm1119_vm0, %v1125_v57, %v1426_v48  ;;  %v1103_v14 = vadd.f32 %v1097_v24, %v1085_v56 }
 0x166   : > { %v1151_v63 = vmul.f32 %v1131_v11, %v1131_v11  ;;  %v1157_v47 = vmul.f32 %v1145_v32, %v1107_v60  ;;  %v1166_v33 = vmul.f32 %v1160_v43, %v1154_v20 }
 0x167   : > { %v913_v29 = vpop.trf.xlu2 }
 0x168   : > { %v1428_v2 = vpop.eup %1427  ;;  %v1163_v9 = vmul.f32 %v1157_v47, %v1151_v63  ;;  %v1172_v8 = vsel %vm1171_vm7, %v1166_v33, 0.0  ;;  %v1481_v63 = vmov 0  }
 0x169   : > { %v1430_v10 = vpop.eup %1429  ;;  %v1063_v18 = vadd.f32 1.0, %v1428_v2  ;;  %v968_v47 = vsel %vm967_vm10, 1, %v1481_v63 }
 0x16a   : > { %v1432_v13 = vpop.eup %1431  ;;  %v1071_v30 = vmul.f32 0.6931472, %v1430_v10  ;;  %v943_v16 = vpop.trf.xlu0  ;;  %v1168_v19 = vadd.f32 %v1163_v9, %v1162_v3  ;;  %v969_v24 = vperm.slane %v968_v47, 0  ;;  %v970_v9 = vperm.slane %v968_v47, 1 }
 0x16b   : > { %v1127_v21 = vmul.f32 %v1432_v13, %v1422_v34  ;;  %1433 = vrcp.f32 %v1063_v18  ;;  %v1141_v34 = vsel %vm1033_vm6, 0.75, %v1479_v38 }
 0x16c   : > { %v1109_v23 = vadd.f32 %v1103_v14, %v1071_v30  ;;  %1435 = vlog2.f32 %v1063_v18  ;;  %v1169_v41 = vadd.f32 %v1168_v19, %v1164_v17  ;;  %v1149_v49 = vmul.f32 %v1864_v7, %v1141_v34 }
 0x16d   : > { %v1133_v25 = vsel %vm1121_vm5, %v1127_v21, %v1432_v13  ;;  %vm971_vm11 = vcmp.ne.s32.totalorder %v969_v24, 0  ;;  %vm972_vm14 = vcmp.ne.s32.totalorder %v970_v9, 0 }
 0x16e   : > { %v1153_v26 = vmul.f32 %v1133_v25, %v1133_v25  ;;  %v1159_v27 = vmul.f32 %v1147_v12, %v1109_v23  ;;  %vm973_vm12 = vmand %vm964_vm3, %vm971_vm11  ;;  %vm999_vm3 = vcmask 1043456  }
 0x16f   : > { %v914_v32 = vpop.trf.xlu2  ;;  %v975_v3 = vsel %vm973_vm12, 1, %v1481_v63  ;;  %vm974_vm15 = vmand %vm965_vm4, %vm972_vm14  ;;  %vm1189_vm4 = vcmask 0  }
 0x170   : > { %v1165_v36 = vmul.f32 %v1159_v27, %v1153_v26  ;;  %v977_v5 = vperm.slane %v975_v3, 0  ;;  %v976_v13 = vsel %vm974_vm15, 1, %v1481_v63 }
 0x171   : > { %v1434_v37 = vpop.eup %1433  ;;  %v978_v16 = vperm.slane %v976_v13, 0 }
 0x172   : > { %v1436_v39 = vpop.eup %1435  ;;  %v944_v42 = vpop.trf.xlu0  ;;  %v1129_v44 = vmul.f32 %v1434_v37, %v1428_v2  ;;  %v1170_v46 = vadd.f32 %v1169_v41, %v1165_v36  ;;  %vm979_vm13 = vcmp.eq.s32.totalorder %v977_v5, 1 }
 0x173   : > { %v1075_v48 = vmul.f32 0.6931472, %v1436_v39  ;;  %vm980_vm0 = vcmp.eq.s32.totalorder %v978_v16, 1 }
 0x174   : > { %v1135_v50 = vsel %vm1123_vm9, %v1129_v44, %v1434_v37  ;;  %v1173_v51 = vadd.f32 %v1172_v8, %v1170_v46 }
 0x175   : > { %v1111_v52 = vadd.f32 %v1105_v28, %v1075_v48  ;;  %v1155_v38 = vmul.f32 %v1135_v50, %v1135_v50 }
 0x177   : > { %v915_v54 = vpop.trf.xlu2  ;;  %v1161_v55 = vmul.f32 %v1149_v49, %v1111_v52 }
 0x179   : > { %v1167_v57 = vmul.f32 %v1161_v55, %v1155_v38 }
 0x17a   : > { %v945_v58 = vpop.trf.xlu0 }
 0x17b   : > { %v1174_v59 = vsel %vm1171_vm7, %v1167_v57, 0.0 }
 0x17c   : > { %v1175_v60 = vadd.f32 %v1174_v59, %v1173_v51  ;;  %v1185_v51 = vld [vmem:[#allocation3] sm:$0x1] }
 0x17f   : > { %v916_v11 = vpop.trf.xlu2 }
 0x182   : > { %v946_v61 = vpop.trf.xlu0 }
 0x187   : > { %v917_v40 = vpop.trf.xlu2 }
 0x18a   : > { %v947_v45 = vpop.trf.xlu0 }
 0x18f   : > { %v918_v56 = vpop.trf.xlu2 }
 0x192   : > { %v948_v62 = vpop.trf.xlu0 }
 0x197   : > { %v919_v7 = vpop.trf.xlu2 }
 0x19a   : > { %v949_v53 = vpop.trf.xlu0 }
 0x19f   : > { %v920_v0 = vpop.trf.xlu2 }
 0x1a2   : > { %v950_v29 = vpop.trf.xlu0 }
 0x1a7   : > { %v921_v1 = vpop.trf.xlu2 }
 0x1aa   : > { %v951_v2 = vpop.trf.xlu0 }
 0x1af   : > { %v922_v12 = vpop.trf.xlu2 }
 0x1b0   : > { %v981_v18 = vsel %vm979_vm13, %v922_v12, 0.0 }
 0x1b1   : > { %v983_v22 = vand.u32 2147483647, %v981_v18 }
 0x1b2   : > { %v952_v10 = vpop.trf.xlu0 }
 0x1b3   : > { %v985_v14 = vmin.f32 %v983_v22, 1.0 }
 0x1b5   : > { %v987_v17 = vmul.f32 0.5, %v985_v14 }
 0x1b7   : > { %v989_v20 = vsub.f32 %v983_v22, %v987_v17 }
 0x1b9   : > { %v991_v23 = vmul.f32 %v989_v20, %v985_v14 }
 0x1ba   : > { %v953_v30 = vpop.trf.xlu0 }
 0x1bb   : > { %v995_v26 = vrot.slane %v991_v23, 4 }
 0x1bd   : > { %v1000_v27 = vsel %vm999_vm3, %v995_v26, 0.0 }
 0x1c2   : > { %v954_v4 = vpop.trf.xlu0 }
 0x1c3   : > { %v982_v19 = vsel %vm980_vm0, %v954_v4, 0.0 }
 0x1c4   : > { %v984_v21 = vand.u32 2147483647, %v982_v19 }
 0x1c6   : > { %v986_v43 = vmin.f32 %v984_v21, 1.0 }
 0x1c8   : > { %v988_v6 = vmul.f32 0.5, %v986_v43 }
 0x1ca   : > { %v990_v41 = vsub.f32 %v984_v21, %v988_v6 }
 0x1cc   : > { %v992_v25 = vmul.f32 %v990_v41, %v986_v43 }
 0x1ce   : > { %v996_v15 = vrot.slane %v992_v25, 4 }
 0x1d0   : > { %v1001_v31 = vsel %vm999_vm3, %v996_v15, 0.0 }
 0x1d1   : > { %v1002_v32 = vadd.f32 %v1001_v31, %v1000_v27 }
 0x1d3   : > { %1003 = vadd.xlane.f32.xlu1 %v1002_v32 }
 0x1db   : > { %1176 = vadd.xlane.f32.xlu1 %v1175_v60 }
 0x246   : > { %v1004_v33 = vpop.xlane.xlu1 %1003 }
 0x247   : > { %v1005_v35 = vrot.slane %v1004_v33, 4 }
 0x249   : > { %v1006_v34 = vadd.f32 %v1005_v35, %v1004_v33 }
 0x24b   : > { %v1007_v36 = vrot.slane %v1006_v34, 2 }
 0x24d   : > { %v1008_v37 = vadd.f32 %v1007_v36, %v1006_v34 }
 0x24e   : > { %v1177_v39 = vpop.xlane.xlu1 %1176 }
 0x24f   : > { %v1178_v42 = vrot.slane %v1177_v39, 4  ;;  %v1009_v44 = vrot.slane %v1008_v37, 1 }
 0x251   : > { %v1179_v46 = vadd.f32 %v1178_v42, %v1177_v39  ;;  %v1010_v28 = vadd.f32 %v1009_v44, %v1008_v37 }
 0x253   : > { %v1180_v48 = vrot.slane %v1179_v46, 2  ;;  %1352 = vpush %v1010_v28 }
 0x255   : > { %v1181_v49 = vadd.f32 %v1180_v48, %v1179_v46 }
 0x257   : > { %v1182_v8 = vrot.slane %v1181_v49, 1 }
 0x259   : > { %v1183_v50 = vadd.f32 %v1182_v8, %v1181_v49 }
 0x25b   : > { %1354 = vpush %v1183_v50 }
 0x284   : > { %s1353_s5 = spop %1352 }
 0x28c   : > { %s1355_s6 = spop %1354 }
 0x28d   : > { %s1186_s7 = sadd.f32 %s1355_s6, %s1353_s5 }
 0x28e   : > { %1194 = sbr.rel (%p1347_p10) target bundleno = 667 (0x29b), region = 44 }
 0x28f   : > { %v1187_v52 = vstv %s1186_s7 }
 0x290   : > { %v1188_v38 = vadd.f32 %v1187_v52, %v1185_v51 }
 0x292   : > { %1190 = vst.msk [vmem:[#allocation3] sm:$0x1] %vm1189_vm4, %v1188_v38 }
 0x299   : > { %v1195_v54 = vld [vmem:[#allocation3] sm:$0x1] }
 0x29a   : > { %1196 = vst.msk [vmem:[%s530_s30] sm:$0x1] %vm1189_vm4, %v1195_v54 }
 0x29b PF: > { %s14_s19 = sadd.s32 1, %s1475_s19   ;;  %s1977_s15 = smov %s1467_s17 }
 0x29c   : > { %p11_p11 = scmp.ge.s32.totalorder %s14_s19, 6   ;;  %s1978_s16 = smov %s1471_s18 }
 0x29d   : > { %s1979_s17 = smov %s1982_s20  ;;  %s1980_s18 = smov %s1986_s21 }
 0x29e   :  { %13 = sbr.rel (!%p11_p11) target bundleno = 3 (0x3), region = 83 }

</bundles_post_ra>
